<compile_context>
chip_gen: v7x
topology: tpu7x:2x2x1
jax: 0.10.0
libtpu: 0.0.40
codegen_flags: <defaults>
</compile_context>

<pallas_src>
import functools

import jax
import jax.numpy as jnp
from jax.experimental import pallas as pl
from jax.experimental.pallas import tpu as pltpu


# HBM-bandwidth knee: measured roofline saturates ~85% at 512-row tiles for
# lane-dense d; bigger tiles only add VMEM pressure and fill/drain latency.
_ROW_TILE_CAP = 512


def _layernorm_kernel(alpha_ref, bias_ref, x_ref, o_ref, *, eps):
    # x_ref: (ROW_TILE, D) tile in VMEM; alpha/bias: (1,) scalars in SMEM.
    x = x_ref[...].astype(jnp.float32)
    n = x.shape[-1]
    mean = jnp.mean(x, axis=-1, keepdims=True)
    diff = x - mean
    # torch.std default uses Bessel's correction (divide by N-1).
    denom = jnp.float32(n - 1)
    var = jnp.sum(diff * diff, axis=-1, keepdims=True) / denom
    std = jnp.sqrt(var)
    # Per-row reciprocal (one per row instead of a per-element divide); exact
    # (approx=False) so sqrt(var)+eps semantics match torch at 1e-5 tolerance.
    inv = pl.reciprocal(std + jnp.float32(eps), approx=False)
    scale = alpha_ref[0] * inv                # (ROW_TILE, 1), hoisted per tile
    o_ref[...] = (diff * scale + bias_ref[0]).astype(o_ref.dtype)


def _vmem_capacity_bytes():
    # TODO(synk): verify get_tpu_info() reports per-TensorCore VMEM on v7x; the
    # conservative clamps below keep us safe either way.
    try:
        return int(pltpu.get_tpu_info().vmem_capacity_bytes)
    except Exception:
        return 64 << 20  # v7x per-core VMEM = smallest of v5e/v6e/v7x


def _num_tensorcores():
    # v5e/v6e have 1 TensorCore per chip; v7x has 2.
    try:
        kind = jax.devices()[0].device_kind.lower()
        if "v7" in kind:
            return 2
    except Exception:
        pass
    return 1


def _round_up(v, m):
    return ((v + m - 1) // m) * m


def _choose_row_tile(rows, d, itemsize, vmem_limit):
    """Row tile (multiple of 8) sized for bandwidth, VMEM and core count."""
    rows8 = _round_up(rows, 8)
    # Footprint per tile row: 2 double-buffered input tiles + 2 double-buffered
    # output tiles (native dtype) + ~3 live f32 temporaries (x_f32, diff, red.).
    per_row_bytes = d * (4 * max(itemsize, 1) + 3 * 4)
    budget = (vmem_limit * 3) // 4
    max_tile = max(8, (budget // per_row_bytes) // 8 * 8)
    tile = min(_ROW_TILE_CAP, max_tile, rows8)
    # v7x only: keep >= 4 grid steps (when rows permit) so both TensorCores get
    # balanced work and the pipeline can hide fill/drain.
    if _num_tensorcores() >= 2 and rows8 >= 32:
        tile = min(tile, max(8, _round_up(pl.cdiv(rows8, 4), 8)))
    return max(8, tile)


def layer_normalisation(x, alpha, bias, *, eps=1e-6):
    """x: (..., D). alpha, bias: shape (1,) parameters (as in the PyTorch module)."""
    orig_shape = x.shape
    d = orig_shape[-1]
    x2 = x.reshape(-1, d)
    rows = x2.shape[0]

    vmem_cap = _vmem_capacity_bytes()
    vmem_limit = int(min((vmem_cap * 3) // 4, 64 << 20))  # 48 MiB v7x, 64 MiB v5e/v6e
    row_tile = _choose_row_tile(rows, d, x.dtype.itemsize, vmem_limit)

    # No host-side padding / slicing: Pallas handles the partial last block
    # (OOB reads only affect their own masked-out output rows; OOB writes are
    # dropped).  This keeps HBM traffic at exactly one read + one write.
    grid = (pl.cdiv(rows, row_tile),)

    # NOTE: the block covers the full d (== array extent) so d < 128 (as in the
    # tiny test) still lowers; for production d_model (multiples of 128) the
    # output is lane-dense.
    out = pl.pallas_call(
        functools.partial(_layernorm_kernel, eps=eps),
        out_shape=jax.ShapeDtypeStruct((rows, d), x.dtype),
        grid_spec=pl.GridSpec(
            grid=grid,
            in_specs=[
                pl.BlockSpec(memory_space=pltpu.MemorySpace.SMEM),  # alpha
                pl.BlockSpec(memory_space=pltpu.MemorySpace.SMEM),  # bias
                pl.BlockSpec((row_tile, d), lambda i: (i, 0)),
            ],
            out_specs=pl.BlockSpec((row_tile, d), lambda i: (i, 0)),
        ),
        compiler_params=pltpu.CompilerParams(
            dimension_semantics=("parallel",),
            vmem_limit_bytes=vmem_limit,
        ),
        # TODO(synk): enable input_output_aliases={2: 0} when callers confirm x
        # is dead after the norm (saves a second rows x d HBM allocation).
    )(alpha, bias, x2)

    return out.reshape(orig_shape)


def decoder_forward(x, encoder_output, src_msk, tgt_msk, *, layers, alpha, bias):
    """Mirrors Decoder.forward: apply each layer, then LayerNormalisation."""
    # TODO(synk): DecoderBlock layers are an unspecified nn.ModuleList in the
    # reference module; they are applied here as plain-JAX callables.
    for layer in layers:
        x = layer(x, encoder_output, src_msk, tgt_msk)
    return layer_normalisation(x, alpha, bias)


def _reference_layernorm(x, alpha, bias, eps=1e-6):
    x = x.astype(jnp.float32)
    mean = jnp.mean(x, axis=-1, keepdims=True)
    n = x.shape[-1]
    var = jnp.sum((x - mean) ** 2, axis=-1, keepdims=True) / (n - 1)
    std = jnp.sqrt(var)
    return alpha[0] * (x - mean) / (std + eps) + bias[0]


if __name__ == "__main__":
    key = jax.random.PRNGKey(0)
    k_x, k_enc, k_big = jax.random.split(key, 3)

    # Deterministic parameter init, exactly as nn.Parameter(torch.ones(1)).
    alpha = jnp.ones((1,), dtype=jnp.float32)
    bias = jnp.ones((1,), dtype=jnp.float32)

    # Small shapes consistent with the Decoder forward signature.
    batch, seq, d_model = 2, 8, 32
    x = jax.random.normal(k_x, (batch, seq, d_model), dtype=jnp.float32)
    encoder_output = jax.random.normal(k_enc, (batch, seq, d_model), dtype=jnp.float32)
    src_msk = jnp.ones((batch, 1, 1, seq), dtype=jnp.float32)
    tgt_msk = jnp.ones((batch, 1, seq, seq), dtype=jnp.float32)

    ref = _reference_layernorm(x, alpha, bias)
    out = decoder_forward(
        x, encoder_output, src_msk, tgt_msk, layers=[], alpha=alpha, bias=bias
    )
    out = jax.block_until_ready(out)
    assert out.shape == x.shape
    assert jnp.allclose(out, ref, atol=1e-5, rtol=1e-5)

    # Second check: odd row count (exercises the partial last block / masked
    # OOB write path) + lane-dense d.
    xb = jax.random.normal(k_big, (3, 37, 256), dtype=jnp.float32)
    refb = _reference_layernorm(xb, alpha, bias)
    outb = jax.block_until_ready(layer_normalisation(xb, alpha, bias))
    assert outb.shape == xb.shape
    assert jnp.allclose(outb, refb, atol=1e-5, rtol=1e-5)

    print("KERNEL_OK")
</pallas_src>

<mosaic_0001>
module attributes {stable_mosaic.version = 11 : i64} {
  func.func @_layernorm_kernel(%arg0: i32, %arg1: memref<1xf32, #tpu.memory_space<smem>>, %arg2: memref<1xf32, #tpu.memory_space<smem>>, %arg3: memref<16x32xf32, #tpu.memory_space<vmem>>, %arg4: memref<16x32xf32, #tpu.memory_space<vmem>>) attributes {dimension_semantics = [#tpu.dimension_semantics<parallel>], iteration_bounds = array<i64: 1>, scalar_prefetch = 0 : i64, scratch_operands = 0 : i64, tpu.core_type = #tpu.core_type<tc>, window_params = [{transform_indices = @transform_0, window_bounds = array<i64: 1>}, {transform_indices = @transform_1, window_bounds = array<i64: 1>}, {transform_indices = @transform_2, window_bounds = array<i64: 16, 32>}, {transform_indices = @transform_3, window_bounds = array<i64: 16, 32>}]} {
    %c0 = arith.constant 0 : index
    %c0_0 = arith.constant 0 : index
    %0 = vector.load %arg3[%c0, %c0_0] : memref<16x32xf32, #tpu.memory_space<vmem>>, vector<16x32xf32>
    %cst = arith.constant dense<0.000000e+00> : vector<16xf32>
    %1 = vector.multi_reduction <add>, %0, %cst [1] : vector<16x32xf32> to vector<16xf32>
    %2 = vector.shape_cast %1 : vector<16xf32> to vector<16x1xf32>
    %cst_1 = arith.constant 3.200000e+01 : f32
    %3 = vector.broadcast %cst_1 : f32 to vector<16x1xf32>
    %4 = arith.divf %2, %3 : vector<16x1xf32>
    %5 = vector.broadcast %4 : vector<16x1xf32> to vector<16x32xf32>
    %6 = arith.subf %0, %5 : vector<16x32xf32>
    %7 = arith.mulf %6, %6 : vector<16x32xf32>
    %cst_2 = arith.constant dense<0.000000e+00> : vector<16xf32>
    %8 = vector.multi_reduction <add>, %7, %cst_2 [1] : vector<16x32xf32> to vector<16xf32>
    %9 = vector.shape_cast %8 : vector<16xf32> to vector<16x1xf32>
    %cst_3 = arith.constant 3.100000e+01 : f32
    %10 = vector.broadcast %cst_3 : f32 to vector<16x1xf32>
    %11 = arith.divf %9, %10 : vector<16x1xf32>
    %12 = math.sqrt %11 : vector<16x1xf32>
    %cst_4 = arith.constant 9.99999997E-7 : f32
    %13 = vector.broadcast %cst_4 : f32 to vector<16x1xf32>
    %14 = arith.addf %12, %13 : vector<16x1xf32>
    %15 = tpu.reciprocal %14 : vector<16x1xf32> -> vector<16x1xf32>
    %c0_5 = arith.constant 0 : index
    %16 = memref.load %arg1[%c0_5] : memref<1xf32, #tpu.memory_space<smem>>
    %17 = vector.broadcast %16 : f32 to vector<16x1xf32>
    %18 = arith.mulf %17, %15 : vector<16x1xf32>
    %19 = vector.broadcast %18 : vector<16x1xf32> to vector<16x32xf32>
    %20 = arith.mulf %6, %19 : vector<16x32xf32>
    %c0_6 = arith.constant 0 : index
    %21 = memref.load %arg2[%c0_6] : memref<1xf32, #tpu.memory_space<smem>>
    %22 = vector.broadcast %21 : f32 to vector<16x32xf32>
    %23 = arith.addf %20, %22 : vector<16x32xf32>
    %c0_7 = arith.constant 0 : index
    %c0_8 = arith.constant 0 : index
    %24 = vector.load %arg4[%c0_7, %c0_8] : memref<16x32xf32, #tpu.memory_space<vmem>>, vector<16x32xf32>
    tpu.vector_store %arg4[%c0_7, %c0_8], %23 {strides = array<i32>} : memref<16x32xf32, #tpu.memory_space<vmem>>, vector<16x32xf32>,
    return
  }
  func.func @transform_0(%arg0: i32) -> i32 {
    %c0_i32 = arith.constant 0 : i32
    %c0_i32_0 = arith.constant 0 : i32
    return %c0_i32 : i32
  }
  func.func @transform_1(%arg0: i32) -> i32 {
    %c0_i32 = arith.constant 0 : i32
    %c0_i32_0 = arith.constant 0 : i32
    return %c0_i32 : i32
  }
  func.func @transform_2(%arg0: i32) -> (i32, i32) {
    %c0_i32 = arith.constant 0 : i32
    %c0_i32_0 = arith.constant 0 : i32
    return %arg0, %c0_i32 : i32, i32
  }
  func.func @transform_3(%arg0: i32) -> (i32, i32) {
    %c0_i32 = arith.constant 0 : i32
    %c0_i32_0 = arith.constant 0 : i32
    return %arg0, %c0_i32 : i32, i32
  }
}

</mosaic_0001>

<bundles_post_ra>
// kernel: tpu_custom_call.1
= control target key start
LH: loop header
LB: loop body
LE: loop exit
PB: predicated region body
PF: predicated region fallthrough
CT: control target
= control target key end

     0   :  { %10 = vsyncpa [#allocation5], 0  ;;  %s229_s0 = inlined_call_operand.<no memory space> [shape: f32[1], index: 0, kind: input, shape index: {}]   ;;  %s230_s1 = inlined_call_operand.<no memory space> [shape: f32[1], index: 1, kind: input, shape index: {}]   ;;  %s231_s2 = inlined_call_operand.hbm [shape: f32[16,32], index: 2, kind: input, shape index: {}]   ;;  %s232_s3 = inlined_call_operand.hbm [shape: f32[16,32], index: 3, kind: output, shape index: {}]  }
   0x1   :  { %11 = vsyncpa [#allocation6], 0  ;;  %s163_s12 = smov [#allocation4]   ;;  %s115_s16 = scalar_lea.hbm %s231_s2, 256 }
   0x2   :  { %s21_s13 = sshll.u32 %s163_s12, 4  ;;  %p116_p0 = scmp.ne.s32.totalorder %s231_s2, %s115_s16  ;;  %s22_s13 = int_to_ptr.vmem [resolvable:$true] %s21_s13 }
   0x3   :  { %p119_p1 = scmp.lt.u32.totalorder %s115_s16, %s231_s2 }
   0x5   :  { %p121_p2 = pnand %p119_p1, %p116_p0 }
   0x7   :  { %124 = shalt.err (!%p121_p2)
}
   0x8   :  { %s125_s21 = scalar_lea.vmem %s22_s13, 256  ;;  %p130_p4 = scmp.lt.s32.totalorder %s22_s13, %s22_s13 }
   0x9   :  { %p126_p3 = scmp.ne.s32.totalorder %s22_s13, %s125_s21  ;;  %p131_p5 = scmp.lt.s32.totalorder %s125_s21, %s125_s21 }
   0xb   :  { %p132_p6 = por %p131_p5, %p130_p4 }
   0xd   :  { %p133_p7 = pnand %p132_p6, %p126_p3 }
   0xf   :  { %136 = shalt.err (!%p133_p7)
}
  0x10   :  { %s164_s22 = smov 128   ;;  %s165_s23 = smov 8  }
  0x11   :  { %27 = dma.hbm_to_vmem [thread:$0]  %s231_s2, 256, %s22_s13, [#allocation5], %s164_s22, %s164_s22, %s165_s23  }
  0x12   :  { %159 = dma.done.wait [#allocation5], 256  }
  0x13   :  { %160 = vsyncadd [#allocation5], 4294967040  ;;  %vm33_vm0 = vcmask 261120   ;;  %v31_v0 = vld [vmem:[#allocation4] sm:$0xff]  ;;  %v32_v1 = vld [vmem:[#allocation4 + $0x8] sm:$0xff]  ;;  %v75_v30 = vstv %s229_s0  ;;  %v81_v33 = vstv %s230_s1  ;;  %s166_s29 = smov [#allocation7]  }
  0x14   :  { %v34_v2 = vsel %vm33_vm0, %v31_v0, 0.0  ;;  %v37_v3 = vsel %vm33_vm0, %v32_v1, 0.0  ;;  %s91_s30 = sshll.u32 %s166_s29, 4  ;;  %s92_s30 = int_to_ptr.vmem [resolvable:$true] %s91_s30 }
  0x15   :  { %35 = vadd.xlane.f32.xlu0 %v34_v2  ;;  %s137_s0 = scalar_lea.vmem %s92_s30, 256  ;;  %p142_p9 = scmp.lt.s32.totalorder %s92_s30, %s92_s30 }
  0x16   :  { %p138_p8 = scmp.ne.s32.totalorder %s92_s30, %s137_s0  ;;  %p143_p10 = scmp.lt.s32.totalorder %s137_s0, %s137_s0 }
  0x18   :  { %p144_p11 = por %p143_p10, %p142_p9 }
  0x19   :  { %38 = vadd.xlane.f32.xlu0 %v37_v3 }
  0x1a   :  { %p145_p12 = pnand %p144_p11, %p138_p8 }
  0xa2   :  { %v36_v4 = vpop.xlane.xlu0 %35 }
  0xa3   :  { %v41_v5 = vmul.f32 0.03125, %v36_v4 }
  0xa5   :  { %v43_v6 = vsub.f32 %v31_v0, %v41_v5 }
  0xa6   :  { %v39_v7 = vpop.xlane.xlu0 %38 }
  0xa7   :  { %v42_v8 = vmul.f32 0.03125, %v39_v7  ;;  %v45_v9 = vmul.f32 %v43_v6, %v43_v6 }
  0xa9   :  { %v44_v10 = vsub.f32 %v32_v1, %v42_v8  ;;  %v47_v11 = vsel %vm33_vm0, %v45_v9, 0.0 }
  0xaa   :  { %48 = vadd.xlane.f32.xlu1 %v47_v11 }
  0xab   :  { %v46_v12 = vmul.f32 %v44_v10, %v44_v10 }
  0xad   :  { %v50_v13 = vsel %vm33_vm0, %v46_v12, 0.0 }
  0xae   :  { %51 = vadd.xlane.f32.xlu1 %v50_v13 }
 0x137   :  { %v49_v14 = vpop.xlane.xlu1 %48 }
 0x138   :  { %v54_v15 = vmul.f32 0.032258064, %v49_v14 }
 0x13a   :  { %107 = vrsqrt.f32 %v54_v15  ;;  %vm58_vm1 = vcmp.eq.f32.partialorder %v54_v15, inf  ;;  %v61_v20 = vand.u32 2147483648, %v54_v15  ;;  %vm60_vm2 = vcmp.eq.f32.partialorder %v54_v15, 0.0 }
 0x13b   :  { %v52_v16 = vpop.xlane.xlu1 %51 }
 0x13c   :  { %v55_v17 = vmul.f32 0.032258064, %v52_v16 }
 0x13e   :  { %109 = vrsqrt.f32 %v55_v17  ;;  %vm65_vm3 = vcmp.eq.f32.partialorder %v55_v17, inf  ;;  %v68_v26 = vand.u32 2147483648, %v55_v17  ;;  %vm67_vm4 = vcmp.eq.f32.partialorder %v55_v17, 0.0 }
 0x144   :  { %v108_v18 = vpop.eup %107 }
 0x145   :  { %v57_v19 = vmul.f32 %v108_v18, %v54_v15 }
 0x147   :  { %v59_v21 = vsel %vm58_vm1, %v54_v15, %v57_v19 }
 0x148   :  { %v110_v22 = vpop.eup %109  ;;  %v62_v23 = vsel %vm60_vm2, %v61_v20, %v59_v21 }
 0x149   :  { %v70_v24 = vadd.f32 1e-06, %v62_v23  ;;  %v64_v25 = vmul.f32 %v110_v22, %v55_v17 }
 0x14b   :  { %111 = vrcp.f32 %v70_v24  ;;  %v66_v27 = vsel %vm65_vm3, %v55_v17, %v64_v25 }
 0x14c   :  { %v69_v28 = vsel %vm67_vm4, %v68_v26, %v66_v27 }
 0x14d   :  { %v71_v29 = vadd.f32 1e-06, %v69_v28 }
 0x14f   :  { %113 = vrcp.f32 %v71_v29 }
 0x155   :  { %v112_v31 = vpop.eup %111 }
 0x156   :  { %v76_v32 = vmul.f32 %v112_v31, %v75_v30 }
 0x158   :  { %v78_v34 = vmul.f32 %v76_v32, %v43_v6 }
 0x159   :  { %v114_v35 = vpop.eup %113 }
 0x15a   :  { %v77_v36 = vmul.f32 %v114_v35, %v75_v30  ;;  %v82_v37 = vadd.f32 %v81_v33, %v78_v34 }
 0x15c   :  { %v79_v38 = vmul.f32 %v77_v36, %v44_v10  ;;  %84 = vst.msk [vmem:[#allocation7] sm:$0xff] %vm33_vm0, %v82_v37 }
 0x15e   :  { %v83_v39 = vadd.f32 %v81_v33, %v79_v38 }
 0x160   :  { %85 = vst.msk [vmem:[#allocation7 + $0x8] sm:$0xff] %vm33_vm0, %v83_v39 }
 0x161   :  { %148 = shalt.err (!%p145_p12)
}
 0x162   :  { %s149_s5 = scalar_lea.hbm %s232_s3, 256 }
 0x163   :  { %p150_p13 = scmp.ne.s32.totalorder %s232_s3, %s149_s5  ;;  %p153_p0 = scmp.lt.u32.totalorder %s149_s5, %s232_s3 }
 0x165   :  { %p155_p1 = pnand %p153_p0, %p150_p13 }
 0x167   :  { %158 = shalt.err (!%p155_p1)
}
 0x168   :  { %97 = dma.vmem_to_hbm [thread:$0]  %s92_s30, 256, %s232_s3, [#allocation6], %s164_s22, %s164_s22, %s165_s23  }
 0x169   :  { %161 = dma.done.wait [#allocation6], 256  }
 0x16a   :  { %162 = vsyncadd [#allocation6], 4294967040 }
 0x16b   :  { %101 = vsyncpa [#allocation5], 1 }
 0x16c   :  { %102 = vsyncpa [#allocation6], 1 }

</bundles_post_ra>
